<compile_context>
chip_gen: v6e
topology: v6e:2x2x1
jax: 0.10.0
libtpu: 0.0.40
codegen_flags: <defaults>
</compile_context>

<pallas_src>
import functools

import jax
import jax.numpy as jnp
from jax.experimental import pallas as pl
from jax.experimental.pallas import tpu as pltpu


def _round_up(x, m):
    return (x + m - 1) // m * m


def mlp_block_kernel(x_ref, w1_ref, b1_ref, w2_ref, b2_ref, g_ref, beta_ref, o_ref, *, eps):
    x = x_ref[...]                                        # (TM, D) f32; kept for residual / LN
    # in_linear + ReLU : bf16 MXU operands, f32 accumulation
    h = jnp.dot(x.astype(w1_ref.dtype), w1_ref[...],
                preferred_element_type=jnp.float32) + b1_ref[...]
    h = jnp.maximum(h, 0.0)
    # (dropout == identity in eval mode)
    # out_linear + residual : cast h explicitly so both MXU operands are bf16
    y = jnp.dot(h.astype(w2_ref.dtype), w2_ref[...],
                preferred_element_type=jnp.float32) + b2_ref[...]
    y = y + x
    # LayerNorm over the feature dim, all f32
    mean = jnp.mean(y, axis=-1, keepdims=True)
    var = jnp.mean(jnp.square(y - mean), axis=-1, keepdims=True)
    y = (y - mean) * jax.lax.rsqrt(var + eps) * g_ref[...] + beta_ref[...]
    o_ref[...] = y.astype(o_ref.dtype)


def mlp_block(x, w1, b1, w2, b2, gamma, beta, *,
              tile_m=512, mxu_dtype=jnp.bfloat16, eps=1e-5):
    """x: [B, S, D] -> [B, S, D]   (D == in_dim == out_dim, required by the residual)."""
    B, S, D = x.shape
    H = w1.shape[1]
    assert w2.shape == (H, D), "residual `out + x` requires out_dim == in_dim"
    N = B * S
    itemsize = jnp.dtype(x.dtype).itemsize

    # ---- tile_m sizing ------------------------------------------------------
    # per-row VMEM working set: double-buffered x & out tiles (f32) + hidden
    # activation + one f32 temp row.
    per_row_bytes = (2 * 2 * D + D) * 4 + H * 4
    tile_budget = 24 << 20                       # fits the 32 MiB default scoped VMEM (v7x-safe)
    tile_m = max(8, (tile_m // 8) * 8)
    tile_m = max(8, min(tile_m, (tile_budget // per_row_bytes) // 8 * 8))
    tile_m = min(tile_m, _round_up(N, 8))        # never pad a small problem up to a huge tile
    if N > 8 and pl.cdiv(N, tile_m) < 2:         # keep >= 2 grid steps: both v7x TCs get work
        tile_m = max(8, _round_up(pl.cdiv(N, 2), 8))

    n_tiles = pl.cdiv(N, tile_m)
    n_pad = n_tiles * tile_m

    x2 = x.reshape(N, D)
    if n_pad != N:
        x2 = jnp.pad(x2, ((0, n_pad - N), (0, 0)))   # padded rows are sliced off below

    # bf16 weights: halve weight DMA/VMEM and hit the MXU bf16 peak; biases/LN params f32.
    w1c = w1.astype(mxu_dtype)
    w2c = w2.astype(mxu_dtype)
    b1_2 = b1.reshape(1, H).astype(jnp.float32)
    b2_2 = b2.reshape(1, D).astype(jnp.float32)
    g_2 = gamma.reshape(1, D).astype(jnp.float32)
    beta_2 = beta.reshape(1, D).astype(jnp.float32)

    # ---- VMEM / cost bookkeeping -------------------------------------------
    w_itemsize = jnp.dtype(mxu_dtype).itemsize
    weight_bytes = 2 * (2 * D * H * w_itemsize + (H + 3 * D) * 4)  # residents, double-buffered
    vmem_estimate = int(weight_bytes + tile_m * per_row_bytes) + (2 << 20)
    compiler_kwargs = dict(dimension_semantics=("parallel",))
    if vmem_estimate > (32 << 20):
        # only raise the scoped limit when needed; stay below v7x's 64 MiB physical
        compiler_kwargs["vmem_limit_bytes"] = min(vmem_estimate, 48 << 20)
    compiler_params = pltpu.CompilerParams(**compiler_kwargs)

    cost = pl.CostEstimate(
        flops=4 * N * D * H,                                        # two matmuls
        transcendentals=N,                                          # rsqrt per row
        bytes_accessed=2 * N * D * itemsize + 2 * D * H * w_itemsize,
    )

    call = pl.pallas_call(
        functools.partial(mlp_block_kernel, eps=eps),
        out_shape=jax.ShapeDtypeStruct((n_pad, D), x.dtype),
        grid_spec=pltpu.PrefetchScalarGridSpec(
            num_scalar_prefetch=0,
            grid=(n_tiles,),
            in_specs=[
                pl.BlockSpec((tile_m, D), lambda i: (i, 0)),   # x tile (pipelined over rows)
                pl.BlockSpec((D, H), lambda i: (0, 0)),        # W1 (grid-invariant, never re-DMA'd)
                pl.BlockSpec((1, H), lambda i: (0, 0)),        # b1
                pl.BlockSpec((H, D), lambda i: (0, 0)),        # W2
                pl.BlockSpec((1, D), lambda i: (0, 0)),        # b2
                pl.BlockSpec((1, D), lambda i: (0, 0)),        # gamma
                pl.BlockSpec((1, D), lambda i: (0, 0)),        # beta
            ],
            out_specs=pl.BlockSpec((tile_m, D), lambda i: (i, 0)),
        ),
        compiler_params=compiler_params,
        cost_estimate=cost,
    )

    out = call(x2, w1c, b1_2, w2c, b2_2, g_2, beta_2)
    if n_pad != N:
        out = out[:N]
    return out.reshape(B, S, D)


def reference(x, w1, b1, w2, b2, gamma, beta, *, mxu_dtype=jnp.bfloat16, eps=1e-5):
    """Pure-JAX reference with the same bf16-operand / f32-accumulate numerics."""
    h = jnp.dot(x.astype(mxu_dtype), w1.astype(mxu_dtype),
                preferred_element_type=jnp.float32) + b1
    h = jnp.maximum(h, 0.0)
    y = jnp.dot(h.astype(mxu_dtype), w2.astype(mxu_dtype),
                preferred_element_type=jnp.float32) + b2 + x
    mean = jnp.mean(y, axis=-1, keepdims=True)
    var = jnp.mean(jnp.square(y - mean), axis=-1, keepdims=True)
    return (y - mean) * jax.lax.rsqrt(var + eps) * gamma + beta


if __name__ == "__main__":
    # Small shapes consistent with the CPTransformer intra_MLP usage:
    # [B, early_cycle, d_model] with lane-dense (128-multiple) feature dims.
    B, S = 2, 8
    d_model, d_ff = 128, 256

    key = jax.random.PRNGKey(0)
    k_x, k_w1, k_b1, k_w2, k_b2 = jax.random.split(key, 5)

    x = jax.random.normal(k_x, (B, S, d_model), dtype=jnp.float32)

    # nn.Linear-style deterministic init: U(-1/sqrt(fan_in), 1/sqrt(fan_in))
    lim1 = 1.0 / (d_model ** 0.5)
    lim2 = 1.0 / (d_ff ** 0.5)
    w1 = jax.random.uniform(k_w1, (d_model, d_ff), jnp.float32, -lim1, lim1)
    b1 = jax.random.uniform(k_b1, (d_ff,), jnp.float32, -lim1, lim1)
    w2 = jax.random.uniform(k_w2, (d_ff, d_model), jnp.float32, -lim2, lim2)
    b2 = jax.random.uniform(k_b2, (d_model,), jnp.float32, -lim2, lim2)
    # nn.LayerNorm init: ones / zeros
    gamma = jnp.ones((d_model,), jnp.float32)
    beta = jnp.zeros((d_model,), jnp.float32)

    out = mlp_block(x, w1, b1, w2, b2, gamma, beta)
    out = jax.block_until_ready(out)

    ref = reference(x, w1, b1, w2, b2, gamma, beta)
    assert out.shape == (B, S, d_model)
    assert jnp.allclose(out, ref, atol=2e-3, rtol=2e-3), \
        float(jnp.max(jnp.abs(out - ref)))

    print("KERNEL_OK")
</pallas_src>

<mosaic_0001>
module attributes {stable_mosaic.version = 11 : i64} {
  func.func @mlp_block_kernel(%arg0: i32, %arg1: memref<8x128xf32, #tpu.memory_space<vmem>>, %arg2: memref<128x256xbf16, #tpu.memory_space<vmem>>, %arg3: memref<1x256xf32, #tpu.memory_space<vmem>>, %arg4: memref<256x128xbf16, #tpu.memory_space<vmem>>, %arg5: memref<1x128xf32, #tpu.memory_space<vmem>>, %arg6: memref<1x128xf32, #tpu.memory_space<vmem>>, %arg7: memref<1x128xf32, #tpu.memory_space<vmem>>, %arg8: memref<8x128xf32, #tpu.memory_space<vmem>>) attributes {dimension_semantics = [#tpu.dimension_semantics<parallel>], iteration_bounds = array<i64: 2>, scalar_prefetch = 0 : i64, scratch_operands = 0 : i64, tpu.core_type = #tpu.core_type<tc>, window_params = [{transform_indices = @transform_0, window_bounds = array<i64: 8, 128>}, {pipeline_mode = #tpu.pipeline_mode<synchronous>, transform_indices = @transform_1, window_bounds = array<i64: 128, 256>}, {pipeline_mode = #tpu.pipeline_mode<synchronous>, transform_indices = @transform_2, window_bounds = array<i64: 1, 256>}, {pipeline_mode = #tpu.pipeline_mode<synchronous>, transform_indices = @transform_3, window_bounds = array<i64: 256, 128>}, {pipeline_mode = #tpu.pipeline_mode<synchronous>, transform_indices = @transform_4, window_bounds = array<i64: 1, 128>}, {pipeline_mode = #tpu.pipeline_mode<synchronous>, transform_indices = @transform_5, window_bounds = array<i64: 1, 128>}, {pipeline_mode = #tpu.pipeline_mode<synchronous>, transform_indices = @transform_6, window_bounds = array<i64: 1, 128>}, {transform_indices = @transform_7, window_bounds = array<i64: 8, 128>}]} {
    %c0 = arith.constant 0 : index
    %c0_0 = arith.constant 0 : index
    %0 = vector.load %arg1[%c0, %c0_0] : memref<8x128xf32, #tpu.memory_space<vmem>>, vector<8x128xf32>
    %1 = arith.truncf %0 : vector<8x128xf32> to vector<8x128xbf16>
    %c0_1 = arith.constant 0 : index
    %c0_2 = arith.constant 0 : index
    %2 = vector.load %arg2[%c0_1, %c0_2] : memref<128x256xbf16, #tpu.memory_space<vmem>>, vector<128x256xbf16>
    %cst = arith.constant dense<0.000000e+00> : vector<8x256xf32>
    %3 = tpu.matmul %1, %2, %cst {dimension_numbers = #tpu.dot_dimension_numbers<[1], [0], [0], [1], [0, 0, 1, 1], [], []>} : vector<8x128xbf16>, vector<128x256xbf16>, vector<8x256xf32> -> vector<8x256xf32>
    %c0_3 = arith.constant 0 : index
    %c0_4 = arith.constant 0 : index
    %4 = vector.load %arg3[%c0_3, %c0_4] : memref<1x256xf32, #tpu.memory_space<vmem>>, vector<1x256xf32>
    %5 = vector.broadcast %4 : vector<1x256xf32> to vector<8x256xf32>
    %6 = arith.addf %3, %5 : vector<8x256xf32>
    %cst_5 = arith.constant 0.000000e+00 : f32
    %7 = vector.broadcast %cst_5 : f32 to vector<8x256xf32>
    %8 = arith.maximumf %6, %7 : vector<8x256xf32>
    %9 = arith.truncf %8 : vector<8x256xf32> to vector<8x256xbf16>
    %c0_6 = arith.constant 0 : index
    %c0_7 = arith.constant 0 : index
    %10 = vector.load %arg4[%c0_6, %c0_7] : memref<256x128xbf16, #tpu.memory_space<vmem>>, vector<256x128xbf16>
    %cst_8 = arith.constant dense<0.000000e+00> : vector<8x128xf32>
    %11 = tpu.matmul %9, %10, %cst_8 {dimension_numbers = #tpu.dot_dimension_numbers<[1], [0], [0], [1], [0, 0, 1, 1], [], []>} : vector<8x256xbf16>, vector<256x128xbf16>, vector<8x128xf32> -> vector<8x128xf32>
    %c0_9 = arith.constant 0 : index
    %c0_10 = arith.constant 0 : index
    %12 = vector.load %arg5[%c0_9, %c0_10] : memref<1x128xf32, #tpu.memory_space<vmem>>, vector<1x128xf32>
    %13 = vector.broadcast %12 : vector<1x128xf32> to vector<8x128xf32>
    %14 = arith.addf %11, %13 : vector<8x128xf32>
    %15 = arith.addf %14, %0 : vector<8x128xf32>
    %cst_11 = arith.constant dense<0.000000e+00> : vector<8xf32>
    %16 = vector.multi_reduction <add>, %15, %cst_11 [1] : vector<8x128xf32> to vector<8xf32>
    %17 = vector.shape_cast %16 : vector<8xf32> to vector<8x1xf32>
    %cst_12 = arith.constant 1.280000e+02 : f32
    %18 = vector.broadcast %cst_12 : f32 to vector<8x1xf32>
    %19 = arith.divf %17, %18 : vector<8x1xf32>
    %20 = vector.broadcast %19 : vector<8x1xf32> to vector<8x128xf32>
    %21 = arith.subf %15, %20 : vector<8x128xf32>
    %22 = arith.mulf %21, %21 : vector<8x128xf32>
    %cst_13 = arith.constant dense<0.000000e+00> : vector<8xf32>
    %23 = vector.multi_reduction <add>, %22, %cst_13 [1] : vector<8x128xf32> to vector<8xf32>
    %24 = vector.shape_cast %23 : vector<8xf32> to vector<8x1xf32>
    %cst_14 = arith.constant 1.280000e+02 : f32
    %25 = vector.broadcast %cst_14 : f32 to vector<8x1xf32>
    %26 = arith.divf %24, %25 : vector<8x1xf32>
    %27 = vector.broadcast %19 : vector<8x1xf32> to vector<8x128xf32>
    %28 = arith.subf %15, %27 : vector<8x128xf32>
    %cst_15 = arith.constant 9.99999974E-6 : f32
    %29 = vector.broadcast %cst_15 : f32 to vector<8x1xf32>
    %30 = arith.addf %26, %29 : vector<8x1xf32>
    %31 = math.rsqrt %30 : vector<8x1xf32>
    %32 = vector.broadcast %31 : vector<8x1xf32> to vector<8x128xf32>
    %33 = arith.mulf %28, %32 : vector<8x128xf32>
    %c0_16 = arith.constant 0 : index
    %c0_17 = arith.constant 0 : index
    %34 = vector.load %arg6[%c0_16, %c0_17] : memref<1x128xf32, #tpu.memory_space<vmem>>, vector<1x128xf32>
    %35 = vector.broadcast %34 : vector<1x128xf32> to vector<8x128xf32>
    %36 = arith.mulf %33, %35 : vector<8x128xf32>
    %c0_18 = arith.constant 0 : index
    %c0_19 = arith.constant 0 : index
    %37 = vector.load %arg7[%c0_18, %c0_19] : memref<1x128xf32, #tpu.memory_space<vmem>>, vector<1x128xf32>
    %38 = vector.broadcast %37 : vector<1x128xf32> to vector<8x128xf32>
    %39 = arith.addf %36, %38 : vector<8x128xf32>
    %c0_20 = arith.constant 0 : index
    %c0_21 = arith.constant 0 : index
    %40 = vector.load %arg8[%c0_20, %c0_21] : memref<8x128xf32, #tpu.memory_space<vmem>>, vector<8x128xf32>
    tpu.vector_store %arg8[%c0_20, %c0_21], %39 {strides = array<i32>} : memref<8x128xf32, #tpu.memory_space<vmem>>, vector<8x128xf32>,
    return
  }
  func.func @transform_0(%arg0: i32) -> (i32, i32) {
    %c0_i32 = arith.constant 0 : i32
    %c0_i32_0 = arith.constant 0 : i32
    return %arg0, %c0_i32 : i32, i32
  }
  func.func @transform_1(%arg0: i32) -> (i32, i32) {
    %c0_i32 = arith.constant 0 : i32
    %c0_i32_0 = arith.constant 0 : i32
    %c0_i32_1 = arith.constant 0 : i32
    return %c0_i32, %c0_i32_0 : i32, i32
  }
  func.func @transform_2(%arg0: i32) -> (i32, i32) {
    %c0_i32 = arith.constant 0 : i32
    %c0_i32_0 = arith.constant 0 : i32
    %c0_i32_1 = arith.constant 0 : i32
    return %c0_i32, %c0_i32_0 : i32, i32
  }
  func.func @transform_3(%arg0: i32) -> (i32, i32) {
    %c0_i32 = arith.constant 0 : i32
    %c0_i32_0 = arith.constant 0 : i32
    %c0_i32_1 = arith.constant 0 : i32
    return %c0_i32, %c0_i32_0 : i32, i32
  }
  func.func @transform_4(%arg0: i32) -> (i32, i32) {
    %c0_i32 = arith.constant 0 : i32
    %c0_i32_0 = arith.constant 0 : i32
    %c0_i32_1 = arith.constant 0 : i32
    return %c0_i32, %c0_i32_0 : i32, i32
  }
  func.func @transform_5(%arg0: i32) -> (i32, i32) {
    %c0_i32 = arith.constant 0 : i32
    %c0_i32_0 = arith.constant 0 : i32
    %c0_i32_1 = arith.constant 0 : i32
    return %c0_i32, %c0_i32_0 : i32, i32
  }
  func.func @transform_6(%arg0: i32) -> (i32, i32) {
    %c0_i32 = arith.constant 0 : i32
    %c0_i32_0 = arith.constant 0 : i32
    %c0_i32_1 = arith.constant 0 : i32
    return %c0_i32, %c0_i32_0 : i32, i32
  }
  func.func @transform_7(%arg0: i32) -> (i32, i32) {
    %c0_i32 = arith.constant 0 : i32
    %c0_i32_0 = arith.constant 0 : i32
    return %arg0, %c0_i32 : i32, i32
  }
}

</mosaic_0001>

<bundles_post_ra>
// kernel: tpu_custom_call.1
= control target key start
LH: loop header
LB: loop body
LE: loop exit
PB: predicated region body
PF: predicated region fallthrough
CT: control target
= control target key end

     0   :  { %s1357_s0 = inlined_call_operand.hbm [shape: f32[16,128], index: 0, kind: input, shape index: {}]   ;;  %s1358_s1 = inlined_call_operand.hbm [shape: bf16[128,256], index: 1, kind: input, shape index: {}]   ;;  %s1359_s2 = inlined_call_operand.vmem [shape: f32[1,256], index: 2, kind: input, shape index: {}]   ;;  %s1360_s3 = inlined_call_operand.hbm [shape: bf16[256,128], index: 3, kind: input, shape index: {}]   ;;  %s1361_s4 = inlined_call_operand.vmem [shape: f32[1,128], index: 4, kind: input, shape index: {}]   ;;  %s1362_s5 = inlined_call_operand.vmem [shape: f32[1,128], index: 5, kind: input, shape index: {}]   ;;  %s1363_s6 = inlined_call_operand.vmem [shape: f32[1,128], index: 6, kind: input, shape index: {}]   ;;  %s1364_s7 = inlined_call_operand.hbm [shape: f32[16,128], index: 7, kind: output, shape index: {}]  }
   0x1   :  { %1369 = sst [smem:[#allocation12_spill]] %s1358_s1 }
   0x2   :  { %1370 = sst [smem:[#allocation13_spill]] %s1360_s3 }
   0x3   :  { %12 = vsyncpa [#allocation3], 0 }
   0x4   :  { %14 = vsyncpa [#allocation3 + $0x1], 0 }
   0x5   :  { %15 = vsyncpa [#allocation6], 0 }
   0x6   :  { %16 = vsyncpa [#allocation4], 0 }
   0x7   :  { %18 = vsyncpa [#allocation4 + $0x1], 0  ;;  %s1173_s24 = smov 0   ;;  %s1175_s25 = smov 0  }
   0x8   :  { %s1177_s26 = smov 0   ;;  %s1179_s27 = smov 0  }
   0x9 LB: > { %s1194_s28 = sadd.s32 4294967295, %s1122_s27   ;;  %s787_s29 = sadd.s32 4294967294, %s1122_s27   ;;  %s1122_s27 = sphi %s1179_s27, %s1390_s27   ;;  %s1118_s26 = sphi %s1177_s26, %s1389_s26   ;;  %s1114_s25 = sphi %s1175_s25, %s1388_s25   ;;  %s1110_s24 = sphi %s1173_s24, %s1387_s24  }
   0xa   : > { %p44_p0 = scmp.ne.s32.totalorder %s1114_s25, %s1110_s24  ;;  %p1365_p1 = scmp.eq.s32.totalorder %s1194_s28, 0 }
   0xb   : > { %p200_p3 = scmp.eq.s32.totalorder %s787_s29, 1  ;;  %p788_p5 = scmp.ge.s32.totalorder %s1122_s27, 1 }
   0xc   : > { %p1203_p4 = por %p1365_p1, %p44_p0  ;;  %p207_p7 = scmp.lt.s32.totalorder %s1122_s27, 3 }
   0xd   : > { %p1208_p6 = por %p200_p3, %p44_p0  ;;  %s1124_s10 = smov [#allocation5]  }
   0xe   : > { %s1371_s30 = scalar_select %p1203_p4, 1, 0 }
   0xf   : > { %s1372_s8 = scalar_select %p1208_p6, 1, 0 }
  0x10   : > { %p1213_p8 = pnand %p788_p5, %p207_p7  ;;  %s219_s11 = sshll.u32 %s1124_s10, 4  ;;  %s220_s11 = int_to_ptr.vmem [resolvable:$true] %s219_s11 }
  0x11   : > { %s1125_s13 = smov [#allocation7]   ;;  %s985_s15 = scalar_lea.vmem %s220_s11, 2048 }
  0x12   : > { %s1373_s9 = scalar_select %p1213_p8, 1, 0 }
  0x13   : > { %p872_p9 = pneg %p1213_p8  ;;  %s235_s14 = sshll.u32 %s1125_s13, 4  ;;  %s236_s14 = int_to_ptr.vmem [resolvable:$true] %s235_s14 }
  0x14   : > { %p986_p13 = scmp.ne.s32.totalorder %s220_s11, %s985_s15  ;;  %p993_p5 = scmp.lt.s32.totalorder %s220_s11, %s220_s11 }
  0x15   : > { %p1222_p11 = pnand %p872_p9, %p1365_p1  ;;  %p994_p7 = scmp.lt.s32.totalorder %s985_s15, %s985_s15 }
  0x17   : > { %p976_p12 = pneg %p1222_p11  ;;  %p995_p10 = por %p994_p7, %p993_p5 }
  0x19   : > { %p988_p0 = pnand %p986_p13, %p976_p12 }
  0x1b   : > { %p989_p3 = pneg %p988_p0 }
  0x1d   : > { %p996_p9 = pnand %p995_p10, %p989_p3 }
  0x1f   : > { %999 = shalt.err (!%p996_p9)
}
  0x20   : > { %s1126_s16 = smov 128   ;;  %s1127_s17 = smov 8  }
  0x21   : > { %s1375_s1 = sld [smem:[#allocation12_spill]]  ;;  %s1011_s20 = scalar_lea.vmem %s236_s14, 2048 }
  0x22   : > { %p1012_p1 = scmp.ne.s32.totalorder %s236_s14, %s1011_s20  ;;  %p1019_p2 = scmp.lt.s32.totalorder %s236_s14, %s236_s14 }
  0x23   : > { %p1020_p6 = scmp.lt.s32.totalorder %s1011_s20, %s1011_s20 }
  0x24   : > { %p1014_p13 = pnand %p1012_p1, %p976_p12 }
  0x25   : > { %p1021_p5 = por %p1020_p6, %p1019_p2 }
  0x26   : > { %p1015_p0 = pneg %p1014_p13 }
  0x27   : > { %875 = dma.hbm_to_vmem [thread:$0]  (!%p1222_p11), %s1375_s1, 2048, %s220_s11, [#allocation6], %s1126_s16, %s1126_s16, %s1127_s17  }
  0x28   : > { %p1022_p10 = pnand %p1021_p5, %p1015_p0 }
  0x2a   : > { %1025 = shalt.err (!%p1022_p10)
}
  0x2b   : > { %s1128_s21 = smov 64   ;;  %s1129_s22 = smov 4  }
  0x2c   : > { %s1376_s3 = sld [smem:[#allocation13_spill]]  ;;  %s1245_s10 = sadd.s32 1, %s1122_s27  }
  0x2d   : > { %s28_s11 = ssub.s32 %s1122_s27, %s1245_s10  ;;  %s31_s13 = sadd.s32 1, %s1118_s26 }
  0x2e   : > { %p29_p1 = scmp.eq.s32.totalorder %s28_s11, 0  ;;  %p38_p2 = scmp.ne.s32.totalorder %s1118_s26, %s1114_s25 }
  0x2f   : > { %p39_p6 = scmp.eq.s32.totalorder %s1122_s27, 0  ;;  %p1377_p3 = scmp.eq.s32.totalorder %s1194_s28, 1 }
  0x30   : > { %s1254_s15 = scalar_select %p29_p1, %s1118_s26, %s31_s13  }
  0x31   : > { %p40_p12 = por %p39_p6, %p38_p2  ;;  %p1258_p7 = por %p1377_p3, %p38_p2 }
  0x32   : > { %878 = dma.hbm_to_vmem [thread:$0]  (!%p1222_p11), %s1376_s3, 2048, %s236_s14, [#allocation6], %s1128_s21, %s1128_s21, %s1129_s22  }
  0x33   : > { %s1378_s16 = scalar_select %p1258_p7, 1, 0 }
  0x34   : > { %p889_p9 = scmp.lt.s32.totalorder %s1122_s27, 2  ;;  %s258_s12 = sand.u32 1, %s1118_s26  }
  0x35   : > { %s792_s17 = sshll.u32 %s258_s12, 3  ;;  %s793_s14 = sshll.u32 %s1122_s27, 7 }
  0x36   : > { %s1268_s20 = scalar_lea.hbm %s1357_s0, %s793_s14  ;;  %s262_s21 = scalar_lea.vmem [#allocation2], %s792_s17 }
  0x37   : > { %s269_s22 = sshll.u32 %s262_s21, 4  ;;  %p1270_p11 = pnand %p889_p9, %p40_p12  ;;  %s270_s22 = int_to_ptr.vmem [resolvable:$true] %s269_s22 }
  0x38   : > { %s259_s29 = scalar_lea.sflag [#allocation3], %s258_s12  ;;  %s1026_s11 = scalar_lea.hbm %s1268_s20, 128 }
  0x39   : > { %p1027_p13 = scmp.ne.s32.totalorder %s1268_s20, %s1026_s11  ;;  %p1028_p0 = pneg %p1270_p11 }
  0x3a   : > { %s1031_s18 = scalar_lea.hbm %s1357_s0, 256  ;;  %p1032_p1 = scmp.lt.s32.totalorder %s1268_s20, %s1357_s0 }
  0x3b   : > { %p1029_p5 = pnand %p1028_p0, %p1027_p13  ;;  %p1033_p2 = scmp.lt.s32.totalorder %s1031_s18, %s1026_s11 }
  0x3d   : > { %p1030_p10 = pneg %p1029_p5  ;;  %p1034_p6 = por %p1033_p2, %p1032_p1 }
  0x3f   : > { %p1035_p12 = pnand %p1034_p6, %p1030_p10 }
  0x41   : > { %1038 = shalt.err (!%p1035_p12)
}
  0x42   : > { %s1039_s21 = scalar_lea.vmem %s270_s22, 128  ;;  %s1130_s12 = smov [#allocation2]  }
  0x43   : > { %p1040_p3 = scmp.ne.s32.totalorder %s270_s22, %s1039_s21  ;;  %s1044_s1 = sshll.u32 %s1130_s12, 4  ;;  %s1045_s1 = int_to_ptr.vmem [resolvable:$false] %s1044_s1 }
  0x44   : > { %s1046_s3 = scalar_lea.vmem %s1045_s1, 256  ;;  %p1047_p13 = scmp.lt.s32.totalorder %s270_s22, %s1045_s1 }
  0x45   : > { %p1042_p9 = pnand %p1040_p3, %p1028_p0  ;;  %p1048_p5 = scmp.lt.s32.totalorder %s1046_s3, %s1039_s21 }
  0x47   : > { %p1043_p7 = pneg %p1042_p9  ;;  %p1049_p4 = por %p1048_p5, %p1047_p13 }
  0x49   : > { %p1050_p8 = pnand %p1049_p4, %p1043_p7 }
  0x4b   : > { %1053 = shalt.err (!%p1050_p8)
}
  0x4c   : > { %882 = dma.hbm_to_vmem [thread:$0]  (!%p1270_p11), %s1268_s20, 128, %s270_s22, %s259_s29  }
  0x4d   : > { %p1380_p10 = scmp.ne.s32.totalorder %s1373_s9, 0 }
  0x4e   : > { %s1291_s11 = sand.u32 (!%p1380_p10), 1, %s1114_s25   ;;  %p1381_p4 = scmp.ne.s32.totalorder (!%p1380_p10), %s1371_s30, 0 }
  0x4f   : > { %278 = sbr.rel (%p1380_p10) target bundleno = 843 (0x34b), region = 48  ;;  %s795_s13 = sshll.u32 (!%p1380_p10), %s1291_s11, 3 }
  0x50   : > { %s281_s1 = scalar_lea.sflag (!%p1380_p10), [#allocation3], %s1291_s11  ;;  %s1297_s3 = scalar_lea.vmem (!%p1380_p10), [#allocation2], %s795_s13 }
  0x54   : > { %1097 = dma.done.wait (%p1381_p4), %s281_s1, 128  }
  0x55   : > { %1099 = vsyncadd (%p1381_p4), %s281_s1, 4294967168  ;;  %p1382_p8 = scmp.eq.s32.totalorder %s1194_s28, 0 }
  0x57   : > { %1101 = dma.done.wait (%p1382_p8), [#allocation6], 4096   ;;  %p1383_p7 = pmov %p1382_p8 }
  0x58   : > { %v1131_v0 = vmov 0   ;;  %v932_v1 = vld [vmem:[#allocation5 + $0x74] ss:$8 sps:$4 sm:$0xff]   ;;  %v934_v2 = vld [vmem:[#allocation5 + $0x70] ss:$8 sps:$4 sm:$0xff]   ;;  %v960_v15 = vld [vmem:[#allocation7 + $0x68] sm:$0xff]   ;;  %v344_v35 = vlaneseq }
  0x59   : > { %1103 = vsyncadd (%p1383_p7), [#allocation6], 4294963200  ;;  %466 = vmatprep.mubr.bf16.mxu0 %v1131_v0  ;;  %434 = vmatprep.subr.bf16.mxu0 %v932_v1  ;;  %v935_v3 = vld [vmem:[#allocation5 + $0x64] ss:$8 sps:$4 sm:$0xff]   ;;  %v937_v4 = vld [vmem:[#allocation5 + $0x60] ss:$8 sps:$4 sm:$0xff]  }
  0x5a   : > { %435 = vmatpush1.bf16.msra.mxu0 %v934_v2  ;;  %v938_v5 = vld [vmem:[#allocation5 + $0x54] ss:$8 sps:$4 sm:$0xff]   ;;  %v940_v6 = vld [vmem:[#allocation5 + $0x50] ss:$8 sps:$4 sm:$0xff]   ;;  %v941_v7 = vld [vmem:[#allocation5 + $0x44] ss:$8 sps:$4 sm:$0xff]  }
  0x5b   : > { %436 = vmatprep.subr.bf16.mxu0 %v935_v3  ;;  %v943_v8 = vld [vmem:[#allocation5 + $0x40] ss:$8 sps:$4 sm:$0xff]   ;;  %v944_v9 = vld [vmem:[#allocation5 + $0x34] ss:$8 sps:$4 sm:$0xff]   ;;  %v946_v12 = vld [vmem:[#allocation5 + $0x30] ss:$8 sps:$4 sm:$0xff]  }
  0x5c   : > { %v956_v10 = vld [vmem:[#allocation7 + $0x78] sm:$0xff]   ;;  %v958_v13 = vld [vmem:[#allocation7 + $0x70] sm:$0xff]   ;;  %v947_v16 = vld [vmem:[#allocation5 + $0x24] ss:$8 sps:$4 sm:$0xff]   ;;  %v345_v36 = vshrl.u32 %v344_v35, 7  ;;  %s835_s19 = sshll.u32 %s1194_s28, 7 }
  0x5d   : > { %v957_v11 = vld [vmem:[#allocation7 + $0x38] sm:$0xff]   ;;  %838 = vmatprep.subr.bf16.mxu1 %v956_v10  ;;  %v959_v14 = vld [vmem:[#allocation7 + $0x30] sm:$0xff]   ;;  %v949_v17 = vld [vmem:[#allocation5 + $0x20] ss:$8 sps:$4 sm:$0xff]   ;;  %s322_s17 = scalar_lea.vmem [#allocation8], %s795_s13  ;;  %s685_s30 = scalar_lea.sflag [#allocation4], %s1291_s11 }
  0x5e   : > { %437 = vmatpush1.bf16.msra.mxu0 %v937_v4  ;;  %839 = vmatpush3.bf16.msra.mxu1 %v957_v11  ;;  %v961_v18 = vld [vmem:[#allocation7 + $0x28] sm:$0xff]   ;;  %v962_v19 = vld [vmem:[#allocation7 + $0x60] sm:$0xff]   ;;  %v950_v20 = vld [vmem:[#allocation5 + $0x14] ss:$8 sps:$4 sm:$0xff]   ;;  %v346_v37 = vsub.s32 0, %v345_v36  ;;  %v350_v39 = vsub.s32 1, %v345_v36 }
  0x5f   : > { %438 = vmatprep.subr.bf16.mxu0 %v938_v5  ;;  %840 = vmatprep.subr.bf16.mxu1 %v958_v13  ;;  %v952_v21 = vld [vmem:[#allocation5 + $0x10] ss:$8 sps:$4 sm:$0xff]   ;;  %v953_v22 = vld [vmem:[#allocation5 + $0x4] ss:$8 sps:$4 sm:$0xff]   ;;  %v955_v26 = vld [vmem:[#allocation5] ss:$8 sps:$4 sm:$0xff]  }
  0x60   : > { %v963_v23 = vld [vmem:[#allocation7 + $0x20] sm:$0xff]   ;;  %v964_v24 = vld [vmem:[#allocation7 + $0x58] sm:$0xff]   ;;  %v966_v28 = vld [vmem:[#allocation7 + $0x50] sm:$0xff]   ;;  %s698_s21 = sshll.u32 %s322_s17, 4  ;;  %p1384_p0 = scmp.ne.s32.totalorder %s1378_s16, 0  ;;  %s699_s21 = int_to_ptr.vmem [resolvable:$true] %s698_s21 }
  0x61   : > { %v965_v25 = vld [vmem:[#allocation7 + $0x18] sm:$0xff]   ;;  %v967_v30 = vld [vmem:[#allocation7 + $0x10] sm:$0xff]   ;;  %v968_v31 = vld [vmem:[#allocation7 + $0x48] sm:$0xff]   ;;  %s1054_s9 = scalar_lea.vmem %s699_s21, 128  ;;  %s1132_s20 = smov [#allocation8]  }
  0x62   : > { %439 = vmatpush1.bf16.msra.mxu0 %v940_v6  ;;  %841 = vmatpush3.bf16.msra.mxu1 %v959_v14  ;;  %v324_v27 = vld [vmem:[%s1297_s3] sm:$0xff]  ;;  %v969_v32 = vld [vmem:[#allocation7 + $0x8] sm:$0xff]   ;;  %v970_v33 = vld [vmem:[#allocation7 + $0x40] sm:$0xff]   ;;  %s696_s3 = scalar_lea.hbm %s1364_s7, %s835_s19  ;;  %p1055_p11 = scmp.ne.s32.totalorder %s699_s21, %s1054_s9 }
  0x63   : > { %440 = vmatprep.subr.bf16.mxu0 %v941_v7  ;;  %842 = vmatprep.subr.bf16.mxu1 %v960_v15  ;;  %v325_v29 = vpack.c.bf16 %v324_v27, %v324_v27  ;;  %v971_v34 = vld [vmem:[#allocation7] sm:$0xff]   ;;  %v342_v38 = vld [vmem:[%s1359_s2] sm:$0x3]  ;;  %s1058_s22 = sshll.u32 %s1132_s20, 4  ;;  %s1059_s22 = int_to_ptr.vmem [resolvable:$false] %s1058_s22 }
  0x64   : > { %v347_v40 = vrot.slane %v342_v38, %v346_v37  ;;  %v351_v41 = vrot.slane %v342_v38, %v350_v39  ;;  %v815_v53 = vld [vmem:[%s1361_s4] ss:$0 sm:$0xff]  ;;  %p1056_p1 = pnand %p1055_p11, %p1384_p0  ;;  %s1060_s28 = scalar_lea.vmem %s1059_s22, 256 }
  0x65   : > { %v832_v4 = vld [vmem:[%s1362_s5] ss:$0 sm:$0xff]  ;;  %p1061_p6 = scmp.lt.s32.totalorder %s699_s21, %s1059_s22  ;;  %p1062_p12 = scmp.lt.s32.totalorder %s1060_s28, %s1054_s9 }
  0x66   : > { %441 = vmatpush1.bf16.msra.mxu0 %v943_v8  ;;  %843 = vmatpush3.bf16.msra.mxu1 %v961_v18  ;;  %v833_v6 = vld [vmem:[%s1363_s6] ss:$0 sm:$0xff]  ;;  %p1057_p2 = pneg %p1056_p1 }
  0x67   : > { %442 = vmatprep.subr.bf16.mxu0 %v944_v9  ;;  %844 = vmatprep.subr.bf16.mxu1 %v962_v19  ;;  %p1063_p3 = por %p1062_p12, %p1061_p6 }
  0x69   : > { %p1064_p9 = pnand %p1063_p3, %p1057_p2 }
  0x6a   : > { %443 = vmatpush1.bf16.msra.mxu0 %v946_v12  ;;  %845 = vmatpush3.bf16.msra.mxu1 %v963_v23 }
  0x6b   : > { %444 = vmatprep.subr.bf16.mxu0 %v947_v16  ;;  %846 = vmatprep.subr.bf16.mxu1 %v964_v24 }
  0x6e   : > { %445 = vmatpush1.bf16.msra.mxu0 %v949_v17  ;;  %847 = vmatpush3.bf16.msra.mxu1 %v965_v25 }
  0x6f   : > { %446 = vmatprep.subr.bf16.mxu0 %v950_v20  ;;  %848 = vmatprep.subr.bf16.mxu1 %v966_v28 }
  0x72   : > { %447 = vmatpush1.bf16.msra.mxu0 %v952_v21  ;;  %849 = vmatpush3.bf16.msra.mxu1 %v967_v30 }
  0x73   : > { %448 = vmatprep.subr.bf16.mxu0 %v953_v22  ;;  %850 = vmatprep.subr.bf16.mxu1 %v968_v31 }
  0x76   : > { %449 = vmatpush1.bf16.msra.mxu0 %v955_v26  ;;  %851 = vmatpush3.bf16.msra.mxu1 %v969_v32 }
  0x77   : > { %852 = vmatprep.subr.bf16.mxu1 %v970_v33 }
  0x79   : > { %467 = vmatmul.mubr.bf16.vlgmr.msra.gmra.mxu0 %v325_v29 }
  0x7a   : > { %853 = vmatpush3.bf16.msra.mxu1 %v971_v34 }
 0x139   : > { %v468_v42 = vpop.f32.mrf.mxu0 }
 0x13a   : > { %v469_v43 = vadd.f32 %v468_v42, %v347_v40 }
 0x13b   : > { %v470_v44 = vpop.f32.mrf.mxu0 }
 0x13c   : > { %v471_v45 = vadd.f32 %v470_v44, %v351_v41  ;;  %v475_v46 = vmax.f32 %v469_v43, 0.0 }
 0x13d   : > { %v472_v47 = vpop.f32.mrf.mxu0 }
 0x13e   : > { %v476_v48 = vmax.f32 %v471_v45, 0.0  ;;  %v477_v51 = vpack.c.bf16 %v475_v46, %v475_v46 }
 0x13f   : > { %v473_v49 = vpop.f32.mrf.mxu0 }
 0x140   : > { %v478_v50 = vpack.c.bf16 %v476_v48, %v476_v48 }
 0x142   : > { %646 = vmatprep.mubr.bf16.mxu1 %v478_v50 }
 0x143   : > { %647 = vmatmul.mubr.bf16.vlgmr.msra.gmra.mxu1 %v477_v51 }
 0x203   : > { %v854_v52 = vpop.f32.mrf.mxu1 }
 0x205   : > { %v855_v54 = vpop.f32.mrf.mxu1 }
 0x206   : > { %v856_v55 = vadd.f32 %v855_v54, %v854_v52 }
 0x207   : > { %v857_v56 = vpop.f32.mrf.mxu1 }
 0x208   : > { %v649_v57 = vadd.f32 %v856_v55, %v815_v53 }
 0x209   : > { %v858_v58 = vpop.f32.mrf.mxu1 }
 0x20a   : > { %v654_v59 = vadd.f32 %v649_v57, %v324_v27 }
 0x20c   : > { %655 = vadd.xlane.f32.xlu0 %v654_v59 }
 0x295   : > { %v656_v60 = vpop.xlane.xlu0 %655 }
 0x296   : > { %v658_v61 = vmul.f32 0.0078125, %v656_v60 }
 0x298   : > { %v659_v62 = vsub.f32 %v654_v59, %v658_v61 }
 0x29a   : > { %v660_v63 = vmul.f32 %v659_v62, %v659_v62 }
 0x29c   : > { %661 = vadd.xlane.f32.xlu0 %v660_v63 }
 0x325   : > { %v662_v0 = vpop.xlane.xlu0 %661 }
 0x326   : > { %v663_v1 = vmul.f32 0.0078125, %v662_v0 }
 0x328   : > { %v664_v2 = vadd.f32 1e-05, %v663_v1 }
 0x32a   : > { %972 = vrsqrt.f32 %v664_v2 }
 0x337   : > { %v973_v3 = vpop.eup %972 }
 0x338   : > { %v666_v5 = vmul.f32 %v973_v3, %v659_v62 }
 0x33a   : > { %v674_v7 = vmul.f32 %v832_v4, %v666_v5 }
 0x33c   : > { %v682_v8 = vadd.f32 %v833_v6, %v674_v7 }
 0x33e   : > { %683 = vst [vmem:[%s322_s17] sm:$0xff] %v682_v8 }
 0x33f   : > { %1067 = shalt.err (!%p1064_p9)
}
 0x340   : > { %s1068_s13 = scalar_lea.hbm %s696_s3, 128  ;;  %s1072_s29 = scalar_lea.hbm %s1364_s7, 256 }
 0x341   : > { %p1069_p13 = scmp.ne.s32.totalorder %s696_s3, %s1068_s13  ;;  %p1073_p4 = scmp.lt.s32.totalorder %s696_s3, %s1364_s7 }
 0x342   : > { %p1074_p8 = scmp.lt.s32.totalorder %s1072_s29, %s1068_s13 }
 0x343   : > { %p1070_p5 = pnand %p1069_p13, %p1384_p0 }
 0x344   : > { %p1075_p7 = por %p1074_p8, %p1073_p4 }
 0x345   : > { %p1071_p10 = pneg %p1070_p5 }
 0x347   : > { %p1076_p11 = pnand %p1075_p7, %p1071_p10 }
 0x349   : > { %1079 = shalt.err (!%p1076_p11)
}
 0x34a   : > { %870 = dma.vmem_to_hbm [thread:$0]  (%p1384_p0), %s699_s21, 128, %s696_s3, %s685_s30  }
 0x34b PF: > { %s710_s19 = sand.u32 1, %s1110_s24   ;;  %p1385_p1 = scmp.ne.s32.totalorder %s1372_s8, 0 }
 0x34c   : > { %p1386_p2 = scmp.ge.s32.totalorder %s1122_s27, 2  ;;  %s711_s17 = scalar_lea.sflag [#allocation4], %s710_s19 }
 0x34e   : > { %p884_p6 = pnand %p1386_p2, %p1385_p1 }
 0x350   : > { %p885_p12 = pneg %p884_p6 }
 0x352   : > { %1105 = dma.done.wait (%p885_p12), %s711_s17, 128  }
 0x353   : > { %1107 = vsyncadd (%p885_p12), %s711_s17, 4294967168  ;;  %p21_p3 = scmp.ge.s32.totalorder %s1245_s10, 4   ;;  %s1387_s24 = smov %s1114_s25 }
 0x354   : > { %s1388_s25 = smov %s1118_s26  ;;  %s1389_s26 = smov %s1254_s15 }
 0x355   : > { %s1390_s27 = smov %s1245_s10  ;;  %23 = sbr.rel (!%p21_p3) target bundleno = 9 (0x9), region = 101 }
 0x35a   :  { %716 = vsyncpa [#allocation3], 1 }
 0x35b   :  { %718 = vsyncpa [#allocation3 + $0x1], 1 }
 0x35c   :  { %719 = vsyncpa [#allocation6], 1 }
 0x35d   :  { %720 = vsyncpa [#allocation4], 1 }
 0x35e   :  { %722 = vsyncpa [#allocation4 + $0x1], 1 }

</bundles_post_ra>
